<compile_context>
chip_gen: v6e
topology: v6e:2x2x1
jax: 0.10.0
libtpu: 0.0.40
codegen_flags: <defaults>
</compile_context>

<pallas_src>
import jax
import jax.numpy as jnp
from jax.experimental import pallas as pl
from jax.experimental.pallas import tpu as pltpu


def probe_head_kernel(emb_ref, mask_ref, w_ref, b_ref, out_ref, acc_ref):
    """Fused entity_sum + linear + log_softmax (accumulating over the S grid axis).

    emb_ref : (tb, ts, H) bfloat16   hidden-state tile
    mask_ref: (tb, ts, 1) float32    target-word mask tile (0/1)
    w_ref   : (H, C)      float32    linear weight (transposed vs. nn.Linear)
    b_ref   : (1, C)      float32    linear bias
    out_ref : (tb, 1, C)  float32    log-probabilities (written on last S step)
    acc_ref : (tb, H)     float32    VMEM scratch accumulator (entity sum)
    """
    s_idx = pl.program_id(1)

    @pl.when(s_idx == 0)
    def _init():
        acc_ref[...] = jnp.zeros_like(acc_ref)

    # entity_sum: VPU multiply + sublane reduce (keeps the MXU off the
    # critical path; mask is 0/1 so the product is exact), f32 accumulation.
    emb = emb_ref[...].astype(jnp.float32)          # (tb, ts, H)
    mask = mask_ref[...]                            # (tb, ts, 1) f32
    acc_ref[...] += jnp.sum(emb * mask, axis=1)     # (tb, H)

    @pl.when(s_idx == pl.num_programs(1) - 1)
    def _finalize():
        sum_vec = acc_ref[...]                      # (tb, H)
        # nn.Linear(768, C): sum_vec @ W + b   (MXU, f32 accumulate)
        logits = (
            jnp.dot(sum_vec, w_ref[...], preferred_element_type=jnp.float32)
            + b_ref[...]
        )                                           # (tb, C)
        # F.log_softmax(logits, dim=1), max-shifted for stability
        m = jnp.max(logits, axis=1, keepdims=True)
        shifted = logits - m
        lse = jnp.log(jnp.sum(jnp.exp(shifted), axis=1, keepdims=True))
        out_ref[:, 0, :] = (shifted - lse).astype(out_ref.dtype)


def bert_probe_head(hidden, target_word_mask, w, b, *, tb=None, ts=None):
    """Probe head on top of (B, S, H) hidden states.

    hidden           : (B, S, H) bfloat16 (or any float; bf16 recommended)
    target_word_mask : (B, S) int/float 0-1 mask
    w                : (H, C) float32  (transposed vs. torch nn.Linear weight)
    b                : (C,)   float32
    returns          : (B, C) float32 log-probabilities
    """
    B, S, H = hidden.shape
    C = w.shape[1]

    if tb is None:
        tb = min(B, 8)
    if ts is None:
        ts = S if S <= 256 else 256
    assert B % tb == 0 and S % ts == 0, "tile sizes must divide (B, S)"
    assert ts % 8 == 0 or ts == S, "ts must be a multiple of 8 (sublane tiling)"

    hidden_bf16 = hidden.astype(jnp.bfloat16)                 # dominant HBM stream in bf16
    mask3 = target_word_mask.astype(jnp.float32).reshape(B, S, 1)
    b2d = b.reshape(1, C).astype(jnp.float32)
    w2d = w.astype(jnp.float32)

    out = pl.pallas_call(
        probe_head_kernel,
        out_shape=jax.ShapeDtypeStruct((B, 1, C), jnp.float32),
        grid_spec=pltpu.PrefetchScalarGridSpec(
            num_scalar_prefetch=0,
            grid=(B // tb, S // ts),
            in_specs=[
                pl.BlockSpec((tb, ts, H), lambda ib, js: (ib, js, 0)),
                pl.BlockSpec((tb, ts, 1), lambda ib, js: (ib, js, 0)),
                pl.BlockSpec((H, C), lambda ib, js: (0, 0)),   # resident: constant index_map
                pl.BlockSpec((1, C), lambda ib, js: (0, 0)),   # resident: constant index_map
            ],
            out_specs=pl.BlockSpec((tb, 1, C), lambda ib, js: (ib, 0, 0)),
            scratch_shapes=[pltpu.VMEM((tb, H), jnp.float32)],
        ),
        compiler_params=pltpu.CompilerParams(
            dimension_semantics=("parallel", "arbitrary"),
        ),
    )(hidden_bf16, mask3, w2d, b2d)
    return out.reshape(B, C)


def bert_probe_classifier_forward(input_ids, attn_mask, target_word_mask, params,
                                  *, tb=None, ts=None):
    """Full forward: synthetic BERT embedding (glue) + Pallas probe head.

    TODO(synk): the pretrained transformer encoder (self.bert) has no Pallas
    equivalent without a checkpoint; a deterministic bf16 embedding lookup is
    used as the hidden-state producer (attn_mask is therefore unused here).
    With a real encoder the hidden states would be produced on-device and fed
    straight to bert_probe_head; fusing the synthetic gather into the kernel
    (scalar-prefetch row gather of only the mask==1 rows) is possible but only
    applies to this stand-in, so it stays as JAX glue.
    """
    hidden = jnp.take(params["emb_table"], input_ids, axis=0)   # (B, S, H) bf16
    return bert_probe_head(hidden, target_word_mask,
                           params["linear_w"], params["linear_b"], tb=tb, ts=ts)


if __name__ == "__main__":
    B, S, H = 4, 32, 768         # batch, max_sequence_len, BERT hidden dim
    C = 4                        # class_count
    VOCAB = 64

    key = jax.random.PRNGKey(0)
    k_emb, k_w, k_b, k_ids = jax.random.split(key, 4)

    params = {
        # synthetic token-embedding table (stand-in for the BERT encoder), bf16
        "emb_table": (jax.random.normal(k_emb, (VOCAB, H), dtype=jnp.float32) * 0.02
                      ).astype(jnp.bfloat16),
        # nn.Linear(768, C) weight is (C, 768) in torch; stored transposed (H, C)
        "linear_w": jax.random.normal(k_w, (H, C), dtype=jnp.float32) * 0.02,
        "linear_b": jax.random.normal(k_b, (C,), dtype=jnp.float32) * 0.01,
    }

    input_ids = jax.random.randint(k_ids, (B, S), 0, VOCAB, dtype=jnp.int32)
    attn_mask = jnp.ones((B, S), dtype=jnp.int32)
    # target_word_mask: contiguous span of 1s per row (e.g. tokens 2..4)
    target_word_mask = jnp.zeros((B, S), dtype=jnp.int32).at[:, 2:5].set(1)

    # Small tiles so the (batch, sequence) grid + accumulator path is exercised:
    # grid = (B//2, S//8) = (2, 4).
    out = bert_probe_classifier_forward(
        input_ids, attn_mask, target_word_mask, params, tb=2, ts=8)
    out = jax.block_until_ready(out)

    # Pure-JAX reference for correctness sanity check.
    hidden = jnp.take(params["emb_table"], input_ids, axis=0).astype(jnp.float32)
    sum_vec = jnp.einsum("bs,bsh->bh", target_word_mask.astype(jnp.float32), hidden)
    ref = jax.nn.log_softmax(sum_vec @ params["linear_w"] + params["linear_b"], axis=1)

    assert out.shape == (B, C)
    assert jnp.allclose(out, ref, atol=1e-4, rtol=1e-4), (out, ref)

    print("KERNEL_OK")
</pallas_src>

<mosaic_0001>
module attributes {stable_mosaic.version = 11 : i64} {
  func.func @probe_head_kernel(%arg0: i32, %arg1: i32, %arg2: memref<2x8x768xbf16, #tpu.memory_space<vmem>>, %arg3: memref<2x8x1xf32, #tpu.memory_space<vmem>>, %arg4: memref<768x4xf32, #tpu.memory_space<vmem>>, %arg5: memref<1x4xf32, #tpu.memory_space<vmem>>, %arg6: memref<2x1x4xf32, #tpu.memory_space<vmem>>, %arg7: memref<2x768xf32, #tpu.memory_space<vmem>>) attributes {dimension_semantics = [#tpu.dimension_semantics<parallel>, #tpu.dimension_semantics<arbitrary>], iteration_bounds = array<i64: 2, 4>, scalar_prefetch = 0 : i64, scratch_operands = 1 : i64, tpu.core_type = #tpu.core_type<tc>, window_params = [{transform_indices = @transform_0, window_bounds = array<i64: 2, 8, 768>}, {transform_indices = @transform_1, window_bounds = array<i64: 2, 8, 1>}, {pipeline_mode = #tpu.pipeline_mode<synchronous>, transform_indices = @transform_2, window_bounds = array<i64: 768, 4>}, {pipeline_mode = #tpu.pipeline_mode<synchronous>, transform_indices = @transform_3, window_bounds = array<i64: 1, 4>}, {transform_indices = @transform_4, window_bounds = array<i64: 2, 1, 4>}]} {
    %c0_i32 = arith.constant 0 : i32
    %0 = arith.cmpi eq, %arg1, %c0_i32 : i32
    %1 = arith.extui %0 : i1 to i32
    %c0_i32_0 = arith.constant 0 : i32
    %2 = arith.cmpi ne, %1, %c0_i32_0 : i32
    scf.if %2 {
      %cst_11 = arith.constant 0.000000e+00 : f32
      %15 = vector.broadcast %cst_11 : f32 to vector<2x768xf32>
      %c0_12 = arith.constant 0 : index
      %c0_13 = arith.constant 0 : index
      %16 = vector.load %arg7[%c0_12, %c0_13] : memref<2x768xf32, #tpu.memory_space<vmem>>, vector<2x768xf32>
      tpu.vector_store %arg7[%c0_12, %c0_13], %15 {strides = array<i32>} : memref<2x768xf32, #tpu.memory_space<vmem>>, vector<2x768xf32>,
    } else {
    }
    %c0 = arith.constant 0 : index
    %c0_1 = arith.constant 0 : index
    %c0_2 = arith.constant 0 : index
    %3 = vector.load %arg2[%c0, %c0_1, %c0_2] : memref<2x8x768xbf16, #tpu.memory_space<vmem>>, vector<2x8x768xbf16>
    %4 = arith.extf %3 : vector<2x8x768xbf16> to vector<2x8x768xf32>
    %c0_3 = arith.constant 0 : index
    %c0_4 = arith.constant 0 : index
    %c0_5 = arith.constant 0 : index
    %5 = vector.load %arg3[%c0_3, %c0_4, %c0_5] : memref<2x8x1xf32, #tpu.memory_space<vmem>>, vector<2x8x1xf32>
    %c0_6 = arith.constant 0 : index
    %c0_7 = arith.constant 0 : index
    %6 = vector.load %arg7[%c0_6, %c0_7] : memref<2x768xf32, #tpu.memory_space<vmem>>, vector<2x768xf32>
    %7 = vector.broadcast %5 : vector<2x8x1xf32> to vector<2x8x768xf32>
    %8 = arith.mulf %4, %7 : vector<2x8x768xf32>
    %cst = arith.constant dense<0.000000e+00> : vector<2x768xf32>
    %9 = vector.multi_reduction <add>, %8, %cst [1] : vector<2x8x768xf32> to vector<2x768xf32>
    %10 = arith.addf %6, %9 : vector<2x768xf32>
    %c0_8 = arith.constant 0 : index
    %c0_9 = arith.constant 0 : index
    %11 = vector.load %arg7[%c0_8, %c0_9] : memref<2x768xf32, #tpu.memory_space<vmem>>, vector<2x768xf32>
    tpu.vector_store %arg7[%c0_8, %c0_9], %10 {strides = array<i32>} : memref<2x768xf32, #tpu.memory_space<vmem>>, vector<2x768xf32>,
    %c3_i32 = arith.constant 3 : i32
    %12 = arith.cmpi eq, %arg1, %c3_i32 : i32
    %13 = arith.extui %12 : i1 to i32
    %c0_i32_10 = arith.constant 0 : i32
    %14 = arith.cmpi ne, %13, %c0_i32_10 : i32
    scf.if %14 {
      %c0_11 = arith.constant 0 : index
      %c0_12 = arith.constant 0 : index
      %15 = vector.load %arg7[%c0_11, %c0_12] : memref<2x768xf32, #tpu.memory_space<vmem>>, vector<2x768xf32>
      %c0_13 = arith.constant 0 : index
      %c0_14 = arith.constant 0 : index
      %16 = vector.load %arg4[%c0_13, %c0_14] : memref<768x4xf32, #tpu.memory_space<vmem>>, vector<768x4xf32>
      %cst_15 = arith.constant dense<0.000000e+00> : vector<2x4xf32>
      %17 = tpu.matmul %15, %16, %cst_15 {dimension_numbers = #tpu.dot_dimension_numbers<[1], [0], [0], [1], [0, 0, 1, 1], [], []>} : vector<2x768xf32>, vector<768x4xf32>, vector<2x4xf32> -> vector<2x4xf32>
      %c0_16 = arith.constant 0 : index
      %c0_17 = arith.constant 0 : index
      %18 = vector.load %arg5[%c0_16, %c0_17] : memref<1x4xf32, #tpu.memory_space<vmem>>, vector<1x4xf32>
      %19 = vector.broadcast %18 : vector<1x4xf32> to vector<2x4xf32>
      %20 = arith.addf %17, %19 : vector<2x4xf32>
      %cst_18 = arith.constant dense<0xFF800000> : vector<2xf32>
      %21 = vector.multi_reduction <maximumf>, %20, %cst_18 [1] : vector<2x4xf32> to vector<2xf32>
      %22 = vector.shape_cast %21 : vector<2xf32> to vector<2x1xf32>
      %23 = vector.broadcast %22 : vector<2x1xf32> to vector<2x4xf32>
      %24 = arith.subf %20, %23 : vector<2x4xf32>
      %25 = math.exp %24 : vector<2x4xf32>
      %cst_19 = arith.constant dense<0.000000e+00> : vector<2xf32>
      %26 = vector.multi_reduction <add>, %25, %cst_19 [1] : vector<2x4xf32> to vector<2xf32>
      %27 = vector.shape_cast %26 : vector<2xf32> to vector<2x1xf32>
      %28 = math.log %27 : vector<2x1xf32>
      %29 = vector.broadcast %28 : vector<2x1xf32> to vector<2x4xf32>
      %30 = arith.subf %24, %29 : vector<2x4xf32>
      %c0_20 = arith.constant 0 : index
      %c0_21 = arith.constant 0 : index
      %c0_22 = arith.constant 0 : index
      %31 = vector.load %arg6[%c0_20, %c0_21, %c0_22] : memref<2x1x4xf32, #tpu.memory_space<vmem>>, vector<2x1x4xf32>
      %32 = vector.shape_cast %31 : vector<2x1x4xf32> to vector<2x4xf32>
      %33 = vector.shape_cast %30 : vector<2x4xf32> to vector<2x1x4xf32>
      tpu.vector_store %arg6[%c0_20, %c0_21, %c0_22], %33 {strides = array<i32>} : memref<2x1x4xf32, #tpu.memory_space<vmem>>, vector<2x1x4xf32>,
    } else {
    }
    return
  }
  func.func @transform_0(%arg0: i32, %arg1: i32) -> (i32, i32, i32) {
    %c0_i32 = arith.constant 0 : i32
    %c0_i32_0 = arith.constant 0 : i32
    return %arg0, %arg1, %c0_i32 : i32, i32, i32
  }
  func.func @transform_1(%arg0: i32, %arg1: i32) -> (i32, i32, i32) {
    %c0_i32 = arith.constant 0 : i32
    %c0_i32_0 = arith.constant 0 : i32
    return %arg0, %arg1, %c0_i32 : i32, i32, i32
  }
  func.func @transform_2(%arg0: i32, %arg1: i32) -> (i32, i32) {
    %c0_i32 = arith.constant 0 : i32
    %c0_i32_0 = arith.constant 0 : i32
    %c0_i32_1 = arith.constant 0 : i32
    return %c0_i32, %c0_i32_0 : i32, i32
  }
  func.func @transform_3(%arg0: i32, %arg1: i32) -> (i32, i32) {
    %c0_i32 = arith.constant 0 : i32
    %c0_i32_0 = arith.constant 0 : i32
    %c0_i32_1 = arith.constant 0 : i32
    return %c0_i32, %c0_i32_0 : i32, i32
  }
  func.func @transform_4(%arg0: i32, %arg1: i32) -> (i32, i32, i32) {
    %c0_i32 = arith.constant 0 : i32
    %c0_i32_0 = arith.constant 0 : i32
    %c0_i32_1 = arith.constant 0 : i32
    return %arg0, %c0_i32, %c0_i32_0 : i32, i32, i32
  }
}

</mosaic_0001>

<bundles_post_ra>
// kernel: tpu_custom_call.1
= control target key start
LH: loop header
LB: loop body
LE: loop exit
PB: predicated region body
PF: predicated region fallthrough
CT: control target
= control target key end

     0   :  { %9 = vsyncpa [#allocation6], 0  ;;  %s1912_s0 = inlined_call_operand.vmem [shape: bf16[4,32,768], index: 0, kind: input, shape index: {}]   ;;  %s1913_s1 = inlined_call_operand.vmem [shape: f32[4,32,1], index: 1, kind: input, shape index: {}]   ;;  %s1914_s2 = inlined_call_operand.vmem [shape: f32[768,4], index: 2, kind: input, shape index: {}]   ;;  %s1915_s3 = inlined_call_operand.vmem [shape: f32[1,4], index: 3, kind: input, shape index: {}]   ;;  %s1916_s4 = inlined_call_operand.hbm [shape: f32[4,1,4], index: 4, kind: output, shape index: {}]  }
   0x1   :  { %11 = vsyncpa [#allocation6 + $0x1], 0  ;;  %s1404_s15 = smov 0   ;;  %s1406_s16 = smov 0  }
   0x2   :  { %s1408_s17 = smov 0   ;;  %s1410_s18 = smov 0  }
   0x3   :  { %s1412_s19 = smov 0   ;;  %s1414_s20 = smov 0  }
   0x4   :  { %s1416_s21 = smov 0   ;;  %s1418_s22 = smov 0  }
   0x5   :  { %s1420_s23 = smov 0   ;;  %s1422_s24 = smov 0  }
   0x6 LB: > { %s1029_s25 = sadd.s32 4294967295, %s1370_s24   ;;  %s1030_s26 = sadd.s32 4294967294, %s1370_s24   ;;  %s1370_s24 = sphi %s1422_s24, %s17_s24   ;;  %s1366_s23 = sphi %s1420_s23, %s1931_s23   ;;  %s1362_s22 = sphi %s1418_s22, %s1930_s22   ;;  %s1358_s21 = sphi %s1416_s21, %s1929_s21   ;;  %s1354_s20 = sphi %s1414_s20, %s1928_s20   ;;  %s1350_s19 = sphi %s1412_s19, %s1927_s19   ;;  %s1346_s18 = sphi %s1410_s18, %s1926_s18   ;;  %s1342_s17 = sphi %s1408_s17, %s1925_s17   ;;  %s1338_s16 = sphi %s1406_s16, %s1924_s16   ;;  %s1334_s15 = sphi %s1404_s15, %s1923_s15  }
   0x7   : > { %s26_s27 = sadd.s32 1, %s1362_s22  ;;  %s29_s28 = sadd.s32 1, %s1366_s23 }
   0x8   : > { %p27_p0 = scmp.ge.s32.totalorder %s26_s27, 4  ;;  %s38_s29 = sadd.s32 1, %s1350_s19 }
   0x9   : > { %p45_p1 = scmp.ne.s32.totalorder %s1350_s19, %s1346_s18  ;;  %p46_p2 = scmp.eq.s32.totalorder %s1370_s24, 0 }
   0xa   : > { %s1933_s27 = smov (%p27_p0, %s26_s27), 0  ;;  %s1935_s28 = smov (!%p27_p0, %s29_s28), %s1366_s23 }
   0xb   : > { %s34_s30 = ssub.s32 %s1362_s22, %s1933_s27  ;;  %p1467_p3 = por %p46_p2, %p45_p1 }
   0xc   : > { %p31_p4 = scmp.ge.s32.totalorder %s1935_s28, 2  ;;  %s134_s6 = sadd.s32 1, %s1342_s17 }
   0xd   : > { %p144_p5 = scmp.ne.s32.totalorder %s1342_s17, %s1338_s16  ;;  %p145_p6 = scmp.eq.s32.totalorder %s1029_s25, 7 }
   0xe   : > { %s1937_s28 = smov (%p31_p4, %s1935_s28), 0  ;;  %p150_p8 = scmp.ne.s32.totalorder %s1338_s16, %s1334_s15 }
   0xf   : > { %1919 = sst [smem:[#allocation8_spill]] %s1937_s28  ;;  %p1476_p7 = por %p145_p6, %p144_p5 }
  0x10   : > { %s33_s8 = ssub.s32 %s1366_s23, %s1937_s28  ;;  %p151_p9 = scmp.eq.s32.totalorder %s1030_s26, 7 }
  0x11   : > { %s35_s9 = sor.u32 %s34_s30, %s33_s8  ;;  %p132_p10 = scmp.eq.s32.totalorder %s33_s8, 0 }
  0x12   : > { %p36_p11 = scmp.eq.s32.totalorder %s35_s9, 0  ;;  %p1484_p12 = por %p151_p9, %p150_p8 }
  0x13   : > { %s1489_s11 = scalar_select %p132_p10, %s1342_s17, %s134_s6  }
  0x14   : > { %s1492_s12 = scalar_select %p36_p11, %s1350_s19, %s38_s29  }
  0x15   : > { %p1032_p13 = scmp.ge.s32.totalorder %s1370_s24, 8 }
  0x17   : > { %173 = sbr.rel (%p1032_p13) target bundleno = 48 (0x30), region = 24 }
  0x1c   : > { %176 = sbr.rel (!%p1467_p3) target bundleno = 40 (0x28), region = 28  ;;  %s178_s13 = sand.u32 (%p1467_p3), 1, %s1350_s19  }
  0x1d   : > { %s1160_s14 = smul.u32 (%p1467_p3), 6, %s1362_s22 }
  0x1e   : > { %s1159_s25 = smul.u32 (%p1467_p3), 48, %s178_s13 }
  0x1f   : > { %s1161_s26 = smul.u32 (%p1467_p3), 48, %s1366_s23 }
  0x20   : > { %s180_s28 = scalar_lea.vmem (%p1467_p3), [#allocation3], %s1159_s25 }
  0x21   : > { %s184_s30 = sadd.s32 %s1161_s26, %s1160_s14 }
  0x22   : > { %s1035_s8 = sshll.u32 %s184_s30, 2 }
  0x23   : > { %s186_s29 = scalar_lea.vmem %s1912_s0, %s1035_s8 }
  0x24   : > { %v199_v0 = vld [vmem:[%s186_s29] sm:$0xff]  ;;  %v201_v1 = vld [vmem:[%s186_s29 + $0x8] sm:$0xff]  ;;  %v203_v2 = vld [vmem:[%s186_s29 + $0x10] sm:$0xff] }
  0x25   : > { %200 = vst [vmem:[%s180_s28] sm:$0xff] %v199_v0  ;;  %202 = vst [vmem:[%s180_s28 + $0x8] sm:$0xff] %v201_v1  ;;  %v205_v3 = vld [vmem:[%s186_s29 + $0x60] sm:$0xff]  ;;  %v207_v4 = vld [vmem:[%s186_s29 + $0x68] sm:$0xff] }
  0x26   : > { %204 = vst [vmem:[%s180_s28 + $0x10] sm:$0xff] %v203_v2  ;;  %v209_v5 = vld [vmem:[%s186_s29 + $0x70] sm:$0xff]  ;;  %206 = vst [vmem:[%s180_s28 + $0x18] sm:$0xff] %v205_v3 }
  0x27   : > { %208 = vst [vmem:[%s180_s28 + $0x20] sm:$0xff] %v207_v4  ;;  %210 = vst [vmem:[%s180_s28 + $0x28] sm:$0xff] %v209_v5 }
  0x28 PF: > { %216 = sbr.rel (!%p1467_p3) target bundleno = 48 (0x30), region = 51  ;;  %s218_s13 = sand.u32 (%p1467_p3), 1, %s1350_s19  }
  0x29   : > { %s1052_s14 = sshll.u32 (%p1467_p3), %s1366_s23, 3  ;;  %s1036_s26 = sshll.u32 (%p1467_p3), %s218_s13, 4 }
  0x2a   : > { %s223_s25 = sadd.s32 (%p1467_p3), %s1362_s22, %s1052_s14  ;;  %s220_s29 = scalar_lea.vmem (%p1467_p3), [#allocation4], %s1036_s26 }
  0x2b   : > { %s1039_s30 = sshll.u32 (%p1467_p3), %s223_s25, 3 }
  0x2c   : > { %s225_s6 = scalar_lea.vmem (%p1467_p3), %s1913_s1, %s1039_s30 }
  0x2d   : > { %v256_v6 = vld [vmem:[%s225_s6] sm:$0xff] }
  0x2e   : > { %v258_v7 = vld [vmem:[%s225_s6 + $0x20] sm:$0xff]  ;;  %257 = vst [vmem:[%s220_s29] sm:$0xff] %v256_v6 }
  0x2f   : > { %259 = vst [vmem:[%s220_s29 + $0x8] sm:$0xff] %v258_v7 }
  0x30 PF: > { %p1040_p0 = scmp.ge.s32.totalorder %s1370_s24, 1  ;;  %p264_p1 = scmp.lt.s32.totalorder %s1370_s24, 9 }
  0x32   : > { %p265_p2 = pnand %p1040_p0, %p264_p1 }
  0x33   : > { %s271_s28 = sand.u32 (!%p265_p2), 1, %s1346_s18   ;;  %s304_s5 = sand.u32 (!%p265_p2), 1, %s1338_s16  }
  0x34   : > { %268 = sbr.rel (%p265_p2) target bundleno = 840 (0x348), region = 89  ;;  %s1041_s14 = sshll.u32 (!%p265_p2), %s271_s28, 4 }
  0x35   : > { %s1162_s13 = smul.u32 (!%p265_p2), 48, %s271_s28  ;;  %s1042_s25 = sshll.u32 (!%p265_p2), %s304_s5, 1 }
  0x36   : > { %s280_s30 = scalar_lea.vmem (!%p265_p2), [#allocation4], %s1041_s14  ;;  %s1519_s8 = scalar_lea.vmem (!%p265_p2), [#allocation5], %s1042_s25 }
  0x37   : > { %s1517_s26 = scalar_lea.vmem (!%p265_p2), [#allocation3], %s1162_s13  ;;  %p1043_p3 = scmp.ne.s32.totalorder (!%p265_p2), %s1354_s20, 0 }
  0x39   : > { %313 = sbr.rel (%p1043_p3) target bundleno = 64 (0x40), region = 101 }
  0x3e   : > { %v1372_v8 = vmov 0.0  }
  0x3f   : > { %314 = vst [vmem:[#allocation2] sm:$0xff] %v1372_v8  ;;  %315 = vst [vmem:[#allocation2 + $0x8] sm:$0xf] %v1372_v8 }
  0x40 PF: > { %v335_v9 = vld [vmem:[%s280_s30 + $0x8] sm:$0xff]  ;;  %v1373_v10 = vmov 0   ;;  %v334_v11 = vld [vmem:[%s280_s30] sm:$0xff]  ;;  %v319_v12 = vld [vmem:[%s1517_s26 + $0x18] sm:$0xff]  ;;  %v449_v22 = vlaneseq  ;;  %v1374_v29 = vmov 1983009808  }
  0x41   : > { %1256 = vset.pattern.permute.xlu0 %v1373_v10  ;;  %v320_v13 = vld [vmem:[%s1517_s26 + $0x20] sm:$0xff]  ;;  %v321_v14 = vld [vmem:[%s1517_s26 + $0x28] sm:$0xff]  ;;  %v328_v15 = vunpack.c.l.bf16 %v319_v12  ;;  %v329_v16 = vunpack.c.h.bf16 %v319_v12  ;;  %v1527_v30 = vunpack.c.l.s4 %v1374_v29  ;;  %v318_v38 = vld [vmem:[%s1517_s26 + $0x10] sm:$0xff]  ;;  %vm499_vm0 = vcmask 1041409   ;;  %p1044_p4 = scmp.ne.s32.totalorder %s1354_s20, 3 }
  0x42   : > { %345 = vperm.xlu0 %1256, %v335_v9   ;;  %v330_v17 = vunpack.c.l.bf16 %v320_v13  ;;  %v331_v18 = vunpack.c.h.bf16 %v320_v13  ;;  %v332_v19 = vunpack.c.l.bf16 %v321_v14  ;;  %v333_v20 = vunpack.c.h.bf16 %v321_v14  ;;  %v316_v21 = vld [vmem:[%s1517_s26] sm:$0xff]  ;;  %v317_v28 = vld [vmem:[%s1517_s26 + $0x8] sm:$0xff] }
  0x43   : > { %v322_v33 = vunpack.c.l.bf16 %v316_v21  ;;  %v323_v41 = vunpack.c.h.bf16 %v316_v21  ;;  %v324_v42 = vunpack.c.l.bf16 %v317_v28  ;;  %v325_v50 = vunpack.c.h.bf16 %v317_v28 }
  0x44   : > { %v326_v51 = vunpack.c.l.bf16 %v318_v38  ;;  %v327_v1 = vunpack.c.h.bf16 %v318_v38  ;;  %v448_v12 = vunpack.c.0.s8 %v1527_v30  ;;  %v1531_v13 = vshrl.u32 %v449_v22, 7 }
  0x45   : > { %vm501_vm1 = vcmask 1043459   ;;  %vm503_vm2 = vcmask 1045509   ;;  %vm505_vm3 = vcmask 1047559  }
  0x46   : > { %340 = vperm.xlu0 %1256, %v334_v11   ;;  %v1534_v29 = vsub.s32 %v448_v12, %v1531_v13 }
  0xbd   : > { %v346_v23 = vpop.permute.xlu0 %345 }
  0xbe   : > { %v354_v24 = vmul.f32 %v346_v23, %v328_v15  ;;  %v355_v25 = vmul.f32 %v346_v23, %v329_v16  ;;  %v356_v26 = vmul.f32 %v346_v23, %v330_v17  ;;  %v357_v27 = vmul.f32 %v346_v23, %v331_v18 }
  0xbf   : > { %v358_v31 = vmul.f32 %v346_v23, %v332_v19  ;;  %v359_v32 = vmul.f32 %v346_v23, %v333_v20 }
  0xc0   : > { %v396_v34 = vrot.slane %v354_v24, 4  ;;  %v402_v35 = vrot.slane %v355_v25, 4  ;;  %v408_v36 = vrot.slane %v356_v26, 4  ;;  %v414_v37 = vrot.slane %v357_v27, 4 }
  0xc1   : > { %v420_v39 = vrot.slane %v358_v31, 4  ;;  %v426_v40 = vrot.slane %v359_v32, 4  ;;  %v341_v47 = vpop.permute.xlu0 %340 }
  0xc2   : > { %v397_v43 = vadd.f32 %v396_v34, %v354_v24  ;;  %v403_v44 = vadd.f32 %v402_v35, %v355_v25  ;;  %v409_v45 = vadd.f32 %v408_v36, %v356_v26  ;;  %v415_v46 = vadd.f32 %v414_v37, %v357_v27 }
  0xc3   : > { %v421_v48 = vadd.f32 %v420_v39, %v358_v31  ;;  %v427_v49 = vadd.f32 %v426_v40, %v359_v32  ;;  %v348_v58 = vmul.f32 %v341_v47, %v322_v33  ;;  %v349_v59 = vmul.f32 %v341_v47, %v323_v41 }
  0xc4   : > { %v398_v52 = vrot.slane %v397_v43, 2  ;;  %v404_v53 = vrot.slane %v403_v44, 2  ;;  %v410_v54 = vrot.slane %v409_v45, 2  ;;  %v416_v55 = vrot.slane %v415_v46, 2 }
  0xc5   : > { %v422_v56 = vrot.slane %v421_v48, 2  ;;  %v428_v57 = vrot.slane %v427_v49, 2  ;;  %v350_v2 = vmul.f32 %v341_v47, %v324_v42  ;;  %v351_v3 = vmul.f32 %v341_v47, %v325_v50 }
  0xc6   : > { %v399_v60 = vadd.f32 %v398_v52, %v397_v43  ;;  %v405_v61 = vadd.f32 %v404_v53, %v403_v44  ;;  %v411_v62 = vadd.f32 %v410_v54, %v409_v45  ;;  %v417_v63 = vadd.f32 %v416_v55, %v415_v46 }
  0xc7   : > { %v423_v0 = vadd.f32 %v422_v56, %v421_v48  ;;  %v429_v8 = vadd.f32 %v428_v57, %v427_v49  ;;  %v352_v9 = vmul.f32 %v341_v47, %v326_v51  ;;  %v360_v10 = vrot.slane %v348_v58, 4 }
  0xc8   : > { %v400_v4 = vrot.slane %v399_v60, 1  ;;  %v406_v5 = vrot.slane %v405_v61, 1  ;;  %v412_v6 = vrot.slane %v411_v62, 1  ;;  %v418_v7 = vrot.slane %v417_v63, 1 }
  0xc9   : > { %v366_v11 = vrot.slane %v349_v59, 4  ;;  %v361_v18 = vadd.f32 %v360_v10, %v348_v58  ;;  %v424_v20 = vrot.slane %v423_v0, 1  ;;  %v353_v21 = vmul.f32 %v341_v47, %v327_v1 }
  0xca   : > { %v401_v14 = vadd.f32 %v400_v4, %v399_v60  ;;  %v407_v15 = vadd.f32 %v406_v5, %v405_v61  ;;  %v413_v16 = vadd.f32 %v412_v6, %v411_v62  ;;  %v419_v17 = vadd.f32 %v418_v7, %v417_v63 }
  0xcb   : > { %v367_v19 = vadd.f32 %v366_v11, %v349_v59  ;;  %v372_v23 = vrot.slane %v350_v2, 4  ;;  %v378_v24 = vrot.slane %v351_v3, 4  ;;  %v430_v25 = vrot.slane %v429_v8, 1  ;;  %v336_v11 = vld [vmem:[#allocation2] sm:$0xff] }
  0xcc   : > { %v362_v26 = vrot.slane %v361_v18, 2  ;;  %v384_v28 = vrot.slane %v352_v9, 4  ;;  %v469_v30 = vcombine.low %v401_v14, %v407_v15  ;;  %v470_v32 = vcombine.low %v413_v16, %v419_v17  ;;  %v337_v16 = vld [vmem:[#allocation2 + $0x8] sm:$0xf] }
  0xcd   : > { %v368_v27 = vrot.slane %v367_v19, 2  ;;  %v373_v22 = vadd.f32 %v372_v23, %v350_v2  ;;  %v379_v31 = vadd.f32 %v378_v24, %v351_v3  ;;  %v425_v36 = vadd.f32 %v424_v20, %v423_v0 }
  0xce   : > { %v363_v33 = vadd.f32 %v362_v26, %v361_v18  ;;  %v385_v35 = vadd.f32 %v384_v28, %v352_v9  ;;  %v390_v39 = vrot.slane %v353_v21, 4  ;;  %v431_v40 = vadd.f32 %v430_v25, %v429_v8 }
  0xcf   : > { %v369_v34 = vadd.f32 %v368_v27, %v367_v19  ;;  %v374_v37 = vrot.slane %v373_v22, 2  ;;  %v380_v38 = vrot.slane %v379_v31, 2  ;;  %v477_v44 = vrot.slane %v469_v30, %v1534_v29 }
  0xd0   : > { %v364_v41 = vrot.slane %v363_v33, 1  ;;  %v386_v43 = vrot.slane %v385_v35, 2  ;;  %v391_v47 = vadd.f32 %v390_v39, %v353_v21  ;;  %v484_v48 = vrot.slane %v470_v32, %v1534_v29 }
  0xd1   : > { %v370_v42 = vrot.slane %v369_v34, 1  ;;  %v375_v45 = vadd.f32 %v374_v37, %v373_v22  ;;  %v381_v46 = vadd.f32 %v380_v38, %v379_v31  ;;  %v486_v57 = vcombine.low %v425_v36, %v431_v40 }
  0xd2   : > { %v365_v49 = vadd.f32 %v364_v41, %v363_v33  ;;  %v387_v51 = vadd.f32 %v386_v43, %v385_v35  ;;  %v392_v54 = vrot.slane %v391_v47, 2  ;;  %v485_v61 = vcombine.low %v477_v44, %v484_v48 }
  0xd3   : > { %v371_v50 = vadd.f32 %v370_v42, %v369_v34  ;;  %v376_v52 = vrot.slane %v375_v45, 1  ;;  %v382_v53 = vrot.slane %v381_v46, 1  ;;  %v493_v2 = vrot.slane %v486_v57, %v1534_v29 }
  0xd4   : > { %v388_v55 = vrot.slane %v387_v51, 1  ;;  %v393_v60 = vadd.f32 %v392_v54, %v391_v47  ;;  %v498_v5 = vrot.slane %v485_v61, 7 }
  0xd5   : > { %v444_v56 = vcombine.low %v365_v49, %v371_v50  ;;  %v377_v58 = vadd.f32 %v376_v52, %v375_v45  ;;  %v383_v59 = vadd.f32 %v382_v53, %v381_v46  ;;  %v509_v8 = vrot.slane %v493_v2, 7 }
  0xd6   : > { %v389_v62 = vadd.f32 %v388_v55, %v387_v51  ;;  %v394_v63 = vrot.slane %v393_v60, 1 }
  0xd7   : > { %v445_v0 = vcombine.low %v377_v58, %v383_v59  ;;  %v452_v1 = vrot.slane %v444_v56, %v1534_v29 }
  0xd8   : > { %v395_v3 = vadd.f32 %v394_v63, %v393_v60 }
  0xd9   : > { %v459_v4 = vrot.slane %v445_v0, %v1534_v29 }
  0xda   : > { %v461_v7 = vcombine.low %v389_v62, %v395_v3 }
  0xdb   : > { %v460_v6 = vcombine.low %v452_v1, %v459_v4 }
  0xdc   : > { %v468_v9 = vrot.slane %v461_v7, %v1534_v29 }
  0xdd   : > { %v500_v10 = vsel %vm499_vm0, %v498_v5, %v460_v6 }
  0xde   : > { %v502_v12 = vsel %vm501_vm1, %v498_v5, %v500_v10  ;;  %v510_v15 = vsel %vm499_vm0, %v509_v8, %v468_v9 }
  0xdf   : > { %v504_v14 = vsel %vm503_vm2, %v498_v5, %v502_v12  ;;  %v511_v18 = vsel %vm501_vm1, %v509_v8, %v510_v15 }
  0xe0   : > { %v506_v17 = vsel %vm505_vm3, %v498_v5, %v504_v14  ;;  %v512_v19 = vsel %vm503_vm2, %v509_v8, %v511_v18  ;;  %523 = sbr.rel (%p1044_p4) target bundleno = 816 (0x330), region = 105 }
  0xe1   : > { %v516_v20 = vadd.f32 %v506_v17, %v336_v11  ;;  %v513_v21 = vsel %vm505_vm3, %v509_v8, %v512_v19 }
  0xe2   : > { %v517_v23 = vadd.f32 %v513_v21, %v337_v16 }
  0xe3   : > { %518 = vst [vmem:[#allocation2] sm:$0xff] %v516_v20 }
  0xe4   : > { %519 = vst [vmem:[#allocation2 + $0x8] sm:$0xf] %v517_v23 }
  0xe5   : > { %v557_v24 = vld [vmem:[%s1914_s2 + $0xf8] sm:$0xff]  ;;  %v556_v26 = vld [vmem:[%s1914_s2 + $0xf0] sm:$0xff]  ;;  %v555_v22 = vld [vmem:[%s1914_s2 + $0xe8] sm:$0xff]  ;;  %vm872_vm4 = vcmask 25600   ;;  %vm910_vm5 = vcmask 24576  }
  0xe6   : > { %v541_v25 = vld [vmem:[%s1914_s2 + $0x78] sm:$0xff]  ;;  %1054 = vmatprep.subr.mxu0 %v557_v24  ;;  %v540_v28 = vld [vmem:[%s1914_s2 + $0x70] sm:$0xff]  ;;  %v539_v32 = vld [vmem:[%s1914_s2 + $0x68] sm:$0xff] }
  0xe7   : > { %v589_v27 = vld [vmem:[%s1914_s2 + $0x1f8] sm:$0xff]  ;;  %1055 = vmatpush3.msra.mxu0 %v541_v25  ;;  %v588_v31 = vld [vmem:[%s1914_s2 + $0x1f0] sm:$0xff]  ;;  %v587_v34 = vld [vmem:[%s1914_s2 + $0x1e8] sm:$0xff] }
  0xe8   : > { %v573_v30 = vld [vmem:[%s1914_s2 + $0x178] sm:$0xff]  ;;  %1089 = vmatprep.subr.mxu1 %v589_v27  ;;  %1056 = vmatprep.subr.mxu0 %v556_v26  ;;  %v572_v33 = vld [vmem:[%s1914_s2 + $0x170] sm:$0xff]  ;;  %v554_v35 = vld [vmem:[%s1914_s2 + $0xe0] sm:$0xff] }
  0xe9   : > { %1090 = vmatpush3.msra.mxu1 %v573_v30  ;;  %1057 = vmatpush3.msra.mxu0 %v540_v28  ;;  %v571_v36 = vld [vmem:[%s1914_s2 + $0x168] sm:$0xff]  ;;  %v538_v37 = vld [vmem:[%s1914_s2 + $0x60] sm:$0xff]  ;;  %v553_v39 = vld [vmem:[%s1914_s2 + $0xd8] sm:$0xff] }
  0xea   : > { %1091 = vmatprep.subr.mxu1 %v588_v31  ;;  %1058 = vmatprep.subr.mxu0 %v555_v22  ;;  %v586_v38 = vld [vmem:[%s1914_s2 + $0x1e0] sm:$0xff]  ;;  %v537_v41 = vld [vmem:[%s1914_s2 + $0x58] sm:$0xff]  ;;  %v552_v43 = vld [vmem:[%s1914_s2 + $0xd0] sm:$0xff] }
  0xeb   : > { %1092 = vmatpush3.msra.mxu1 %v572_v33  ;;  %1059 = vmatpush3.msra.mxu0 %v539_v32  ;;  %v570_v40 = vld [vmem:[%s1914_s2 + $0x160] sm:$0xff]  ;;  %v585_v42 = vld [vmem:[%s1914_s2 + $0x1d8] sm:$0xff]  ;;  %v536_v45 = vld [vmem:[%s1914_s2 + $0x50] sm:$0xff] }
  0xec   : > { %1093 = vmatprep.subr.mxu1 %v587_v34  ;;  %1060 = vmatprep.subr.mxu0 %v554_v35  ;;  %v569_v44 = vld [vmem:[%s1914_s2 + $0x158] sm:$0xff]  ;;  %v584_v46 = vld [vmem:[%s1914_s2 + $0x1d0] sm:$0xff]  ;;  %v551_v47 = vld [vmem:[%s1914_s2 + $0xc8] sm:$0xff] }
  0xed   : > { %1094 = vmatpush3.msra.mxu1 %v571_v36  ;;  %1061 = vmatpush3.msra.mxu0 %v538_v37  ;;  %v568_v48 = vld [vmem:[%s1914_s2 + $0x150] sm:$0xff]  ;;  %v535_v49 = vld [vmem:[%s1914_s2 + $0x48] sm:$0xff]  ;;  %v550_v51 = vld [vmem:[%s1914_s2 + $0xc0] sm:$0xff] }
  0xee   : > { %1095 = vmatprep.subr.mxu1 %v586_v38  ;;  %1062 = vmatprep.subr.mxu0 %v553_v39  ;;  %v583_v50 = vld [vmem:[%s1914_s2 + $0x1c8] sm:$0xff]  ;;  %v534_v53 = vld [vmem:[%s1914_s2 + $0x40] sm:$0xff]  ;;  %v549_v55 = vld [vmem:[%s1914_s2 + $0xb8] sm:$0xff] }
  0xef   : > { %1096 = vmatpush3.msra.mxu1 %v570_v40  ;;  %1063 = vmatpush3.msra.mxu0 %v537_v41  ;;  %v567_v52 = vld [vmem:[%s1914_s2 + $0x148] sm:$0xff]  ;;  %v582_v54 = vld [vmem:[%s1914_s2 + $0x1c0] sm:$0xff]  ;;  %v533_v57 = vld [vmem:[%s1914_s2 + $0x38] sm:$0xff] }
  0xf0   : > { %1097 = vmatprep.subr.mxu1 %v585_v42  ;;  %1064 = vmatprep.subr.mxu0 %v552_v43  ;;  %v566_v56 = vld [vmem:[%s1914_s2 + $0x140] sm:$0xff]  ;;  %v581_v58 = vld [vmem:[%s1914_s2 + $0x1b8] sm:$0xff]  ;;  %v548_v59 = vld [vmem:[%s1914_s2 + $0xb0] sm:$0xff] }
  0xf1   : > { %1098 = vmatpush3.msra.mxu1 %v569_v44  ;;  %1065 = vmatpush3.msra.mxu0 %v536_v45  ;;  %v565_v60 = vld [vmem:[%s1914_s2 + $0x138] sm:$0xff]  ;;  %v532_v61 = vld [vmem:[%s1914_s2 + $0x30] sm:$0xff]  ;;  %v547_v63 = vld [vmem:[%s1914_s2 + $0xa8] sm:$0xff] }
  0xf2   : > { %1099 = vmatprep.subr.mxu1 %v584_v46  ;;  %1066 = vmatprep.subr.mxu0 %v551_v47  ;;  %v580_v62 = vld [vmem:[%s1914_s2 + $0x1b0] sm:$0xff]  ;;  %v531_v1 = vld [vmem:[%s1914_s2 + $0x28] sm:$0xff]  ;;  %v546_v3 = vld [vmem:[%s1914_s2 + $0xa0] sm:$0xff] }
  0xf3   : > { %1100 = vmatpush3.msra.mxu1 %v568_v48  ;;  %1067 = vmatpush3.msra.mxu0 %v535_v49  ;;  %v564_v0 = vld [vmem:[%s1914_s2 + $0x130] sm:$0xff]  ;;  %v579_v2 = vld [vmem:[%s1914_s2 + $0x1a8] sm:$0xff]  ;;  %v524_v5 = vld [vmem:[#allocation2] sm:$0xff] }
  0xf4   : > { %1101 = vmatprep.subr.mxu1 %v583_v50  ;;  %1068 = vmatprep.subr.mxu0 %v550_v51  ;;  %v563_v4 = vld [vmem:[%s1914_s2 + $0x128] sm:$0xff]  ;;  %v530_v6 = vld [vmem:[%s1914_s2 + $0x20] sm:$0xff]  ;;  %v545_v8 = vld [vmem:[%s1914_s2 + $0x98] sm:$0xff]  ;;  %v638_v12 = vrot.slane %v524_v5, %v1534_v29  ;;  %v631_v14 = vcombine.high %v524_v5, %v524_v5 }
  0xf5   : > { %1102 = vmatpush3.msra.mxu1 %v567_v52  ;;  %1069 = vmatpush3.msra.mxu0 %v534_v53  ;;  %v578_v7 = vld [vmem:[%s1914_s2 + $0x1a0] sm:$0xff]  ;;  %v529_v10 = vld [vmem:[%s1914_s2 + $0x18] sm:$0xff]  ;;  %v544_v15 = vld [vmem:[%s1914_s2 + $0x90] sm:$0xff] }
  0xf6   : > { %1103 = vmatprep.subr.mxu1 %v582_v54  ;;  %1070 = vmatprep.subr.mxu0 %v549_v55  ;;  %v562_v9 = vld [vmem:[%s1914_s2 + $0x120] sm:$0xff]  ;;  %v577_v11 = vld [vmem:[%s1914_s2 + $0x198] sm:$0xff]  ;;  %v528_v17 = vld [vmem:[%s1914_s2 + $0x10] sm:$0xff]  ;;  %v646_v24 = vcombine.high %v638_v12, %v638_v12  ;;  %v645_v25 = vrot.slane %v631_v14, %v1534_v29 }
  0xf7   : > { %1104 = vmatpush3.msra.mxu1 %v566_v56  ;;  %1071 = vmatpush3.msra.mxu0 %v533_v57  ;;  %v561_v16 = vld [vmem:[%s1914_s2 + $0x118] sm:$0xff]  ;;  %v576_v18 = vld [vmem:[%s1914_s2 + $0x190] sm:$0xff]  ;;  %v543_v19 = vld [vmem:[%s1914_s2 + $0x88] sm:$0xff] }
  0xf8   : > { %1105 = vmatprep.subr.mxu1 %v581_v58  ;;  %1072 = vmatprep.subr.mxu0 %v548_v59  ;;  %v560_v20 = vld [vmem:[%s1914_s2 + $0x110] sm:$0xff]  ;;  %v527_v21 = vld [vmem:[%s1914_s2 + $0x8] sm:$0xff]  ;;  %v542_v26 = vld [vmem:[%s1914_s2 + $0x80] sm:$0xff]  ;;  %v647_v31 = vcombine.high %v645_v25, %v645_v25 }
  0xf9   : > { %1106 = vmatpush3.msra.mxu1 %v565_v60  ;;  %1073 = vmatpush3.msra.mxu0 %v532_v61  ;;  %v575_v23 = vld [vmem:[%s1914_s2 + $0x188] sm:$0xff]  ;;  %v526_v27 = vld [vmem:[%s1914_s2] sm:$0xff]  ;;  %v621_v30 = vld [vmem:[%s1914_s2 + $0x2f8] sm:$0xff] }
  0xfa   : > { %1107 = vmatprep.subr.mxu1 %v580_v62  ;;  %1074 = vmatprep.subr.mxu0 %v547_v63  ;;  %v559_v28 = vld [vmem:[%s1914_s2 + $0x108] sm:$0xff]  ;;  %v574_v29 = vld [vmem:[%s1914_s2 + $0x180] sm:$0xff]  ;;  %v605_v32 = vld [vmem:[%s1914_s2 + $0x278] sm:$0xff] }
  0xfb   : > { %1108 = vmatpush3.msra.mxu1 %v564_v0  ;;  %1075 = vmatpush3.msra.mxu0 %v531_v1  ;;  %v558_v22 = vld [vmem:[%s1914_s2 + $0x100] sm:$0xff]  ;;  %v1743_v33 = vld.sshfl [vmem:[#allocation2 + $0x8] sm:$0x33 pattern:$0x76325410]  ;;  %v620_v34 = vld [vmem:[%s1914_s2 + $0x2f0] sm:$0xff] }
  0xfc   : > { %1109 = vmatprep.subr.mxu1 %v579_v2  ;;  %1076 = vmatprep.subr.mxu0 %v546_v3  ;;  %v655_v35 = vcombine.high %v1743_v33, %v1743_v33  ;;  %v604_v36 = vld [vmem:[%s1914_s2 + $0x270] sm:$0xff]  ;;  %v619_v37 = vld [vmem:[%s1914_s2 + $0x2e8] sm:$0xff]  ;;  %v618_v39 = vld [vmem:[%s1914_s2 + $0x2e0] sm:$0xff] }
  0xfd   : > { %1110 = vmatpush3.msra.mxu1 %v563_v4  ;;  %1077 = vmatpush3.msra.mxu0 %v530_v6  ;;  %v603_v38 = vld [vmem:[%s1914_s2 + $0x268] sm:$0xff]  ;;  %v602_v40 = vld [vmem:[%s1914_s2 + $0x260] sm:$0xff]  ;;  %v617_v41 = vld [vmem:[%s1914_s2 + $0x2d8] sm:$0xff] }
  0xfe   : > { %1111 = vmatprep.subr.mxu1 %v578_v7  ;;  %1078 = vmatprep.subr.mxu0 %v545_v8  ;;  %v601_v42 = vld [vmem:[%s1914_s2 + $0x258] sm:$0xff]  ;;  %v616_v43 = vld [vmem:[%s1914_s2 + $0x2d0] sm:$0xff]  ;;  %v615_v45 = vld [vmem:[%s1914_s2 + $0x2c8] sm:$0xff] }
  0xff   : > { %1112 = vmatpush3.msra.mxu1 %v562_v9  ;;  %1079 = vmatpush3.msra.mxu0 %v529_v10  ;;  %v600_v44 = vld [vmem:[%s1914_s2 + $0x250] sm:$0xff]  ;;  %v599_v46 = vld [vmem:[%s1914_s2 + $0x248] sm:$0xff]  ;;  %v614_v47 = vld [vmem:[%s1914_s2 + $0x2c0] sm:$0xff] }
 0x100   : > { %1113 = vmatprep.subr.mxu1 %v577_v11  ;;  %1080 = vmatprep.subr.mxu0 %v544_v15  ;;  %v598_v48 = vld [vmem:[%s1914_s2 + $0x240] sm:$0xff]  ;;  %v613_v49 = vld [vmem:[%s1914_s2 + $0x2b8] sm:$0xff]  ;;  %v612_v51 = vld [vmem:[%s1914_s2 + $0x2b0] sm:$0xff] }
 0x101   : > { %1114 = vmatpush3.msra.mxu1 %v561_v16  ;;  %1081 = vmatpush3.msra.mxu0 %v528_v17  ;;  %v597_v50 = vld [vmem:[%s1914_s2 + $0x238] sm:$0xff]  ;;  %v596_v52 = vld [vmem:[%s1914_s2 + $0x230] sm:$0xff]  ;;  %v611_v53 = vld [vmem:[%s1914_s2 + $0x2a8] sm:$0xff] }
 0x102   : > { %1115 = vmatprep.subr.mxu1 %v576_v18  ;;  %1082 = vmatprep.subr.mxu0 %v543_v19  ;;  %v595_v54 = vld [vmem:[%s1914_s2 + $0x228] sm:$0xff]  ;;  %v610_v55 = vld [vmem:[%s1914_s2 + $0x2a0] sm:$0xff]  ;;  %v609_v57 = vld [vmem:[%s1914_s2 + $0x298] sm:$0xff] }
 0x103   : > { %1116 = vmatpush3.msra.mxu1 %v560_v20  ;;  %1083 = vmatpush3.msra.mxu0 %v527_v21  ;;  %v594_v56 = vld [vmem:[%s1914_s2 + $0x220] sm:$0xff]  ;;  %v593_v58 = vld [vmem:[%s1914_s2 + $0x218] sm:$0xff]  ;;  %v608_v59 = vld [vmem:[%s1914_s2 + $0x290] sm:$0xff] }
 0x104   : > { %1117 = vmatprep.subr.mxu1 %v575_v23  ;;  %1084 = vmatprep.subr.mxu0 %v542_v26  ;;  %v592_v60 = vld [vmem:[%s1914_s2 + $0x210] sm:$0xff]  ;;  %v607_v61 = vld [vmem:[%s1914_s2 + $0x288] sm:$0xff]  ;;  %v606_v63 = vld [vmem:[%s1914_s2 + $0x280] sm:$0xff]  ;;  %v1375_v23 = vmov 1966171168  }
 0x105   : > { %726 = vmatprep.mubr.f32.mxu0 %v646_v24  ;;  %1085 = vmatpush3.msra.mxu0 %v526_v27  ;;  %v591_v62 = vld [vmem:[%s1914_s2 + $0x208] sm:$0xff]  ;;  %v590_v0 = vld [vmem:[%s1914_s2 + $0x200] sm:$0xff]  ;;  %v887_v24 = vunpack.c.l.s4 %v1375_v23 }
 0x106   : > { %1118 = vmatpush3.msra.mxu1 %v559_v28  ;;  %727 = vmatmul.mubr.f32.vlgmr.msra.gmra.mxu0 %v638_v12  ;;  %v1045_v5 = vld [vmem:[%s1915_s3] ss:$0 sm:$0xff] }
 0x107   : > { %1119 = vmatprep.subr.mxu1 %v574_v29  ;;  %1124 = vmatprep.subr.mxu0 %v621_v30 }
 0x108   : > { %1120 = vmatpush3.msra.mxu1 %v558_v22  ;;  %796 = vmatprep.mubr.f32.mxu1 %v647_v31 }
 0x109   : > { %1125 = vmatpush3.msra.mxu0 %v605_v32  ;;  %797 = vmatmul.mubr.f32.vlgmr.msra.gmra.mxu1 %v645_v25  ;;  %v888_v25 = vunpack.c.0.s8 %v887_v24 }
 0x10a   : > { %1126 = vmatprep.subr.mxu0 %v620_v34  ;;  %866 = vmatprep.mubr.f32.mxu0 %v655_v35 }
 0x10b   : > { %1127 = vmatpush3.msra.mxu0 %v604_v36  ;;  %v891_v27 = vsub.s32 %v888_v25, %v1531_v13 }
 0x10c   : > { %1128 = vmatprep.subr.mxu0 %v619_v37 }
 0x10d   : > { %1129 = vmatpush3.msra.mxu0 %v603_v38 }
 0x10e   : > { %1130 = vmatprep.subr.mxu0 %v618_v39 }
 0x10f   : > { %1131 = vmatpush3.msra.mxu0 %v602_v40 }
 0x110   : > { %1132 = vmatprep.subr.mxu0 %v617_v41 }
 0x111   : > { %1133 = vmatpush3.msra.mxu0 %v601_v42 }
 0x112   : > { %1134 = vmatprep.subr.mxu0 %v616_v43 }
 0x113   : > { %1135 = vmatpush3.msra.mxu0 %v600_v44 }
 0x114   : > { %1136 = vmatprep.subr.mxu0 %v615_v45 }
 0x115   : > { %1137 = vmatpush3.msra.mxu0 %v599_v46 }
 0x116   : > { %1138 = vmatprep.subr.mxu0 %v614_v47 }
 0x117   : > { %1139 = vmatpush3.msra.mxu0 %v598_v48 }
 0x118   : > { %1140 = vmatprep.subr.mxu0 %v613_v49 }
 0x119   : > { %1141 = vmatpush3.msra.mxu0 %v597_v50 }
 0x11a   : > { %1142 = vmatprep.subr.mxu0 %v612_v51 }
 0x11b   : > { %1143 = vmatpush3.msra.mxu0 %v596_v52 }
 0x11c   : > { %1144 = vmatprep.subr.mxu0 %v611_v53 }
 0x11d   : > { %1145 = vmatpush3.msra.mxu0 %v595_v54 }
 0x11e   : > { %1146 = vmatprep.subr.mxu0 %v610_v55 }
 0x11f   : > { %1147 = vmatpush3.msra.mxu0 %v594_v56 }
 0x120   : > { %1148 = vmatprep.subr.mxu0 %v609_v57 }
 0x121   : > { %1149 = vmatpush3.msra.mxu0 %v593_v58 }
 0x122   : > { %1150 = vmatprep.subr.mxu0 %v608_v59 }
 0x123   : > { %1151 = vmatpush3.msra.mxu0 %v592_v60 }
 0x124   : > { %1152 = vmatprep.subr.mxu0 %v607_v61 }
 0x125   : > { %1153 = vmatpush3.msra.mxu0 %v591_v62 }
 0x126   : > { %1154 = vmatprep.subr.mxu0 %v606_v63 }
 0x127   : > { %1155 = vmatpush3.msra.mxu0 %v590_v0 }
 0x128   : > { %867 = vmatmul.mubr.f32.vlgmr.msra.gmra.mxu0 %v1743_v33 }
 0x1c6   : > { %v1086_v1 = vpop.f32.mrf.mxu0 }
 0x1c8   : > { %v1087_v2 = vpop.f32.mrf.mxu0 }
 0x1c9   : > { %v1121_v3 = vpop.f32.mrf.mxu1  ;;  %v1088_v4 = vadd.f32 %v1087_v2, %v1086_v1 }
 0x1cb   : > { %v1122_v6 = vpop.f32.mrf.mxu1  ;;  %v729_v7 = vadd.f32 %v1088_v4, %v1045_v5 }
 0x1cc   : > { %v1123_v8 = vadd.f32 %v1122_v6, %v1121_v3 }
 0x1ce   : > { %v799_v11 = vadd.f32 %v1123_v8, %v729_v7 }
 0x1e8   : > { %v1156_v9 = vpop.f32.mrf.mxu0 }
 0x1ea   : > { %v1157_v10 = vpop.f32.mrf.mxu0 }
 0x1eb   : > { %v1158_v12 = vadd.f32 %v1157_v10, %v1156_v9 }
 0x1ed   : > { %v869_v14 = vadd.f32 %v1158_v12, %v799_v11 }
 0x1ef   : > { %v873_v15 = vsel %vm872_vm4, %v869_v14, -inf }
 0x1f0   : > { %874 = vmax.xlane.f32.xlu0 %v873_v15 }
 0x279   : > { %v875_v16 = vpop.xlane.xlu0 %874 }
 0x27a   : > { %v876_v17 = vsub.f32 %v869_v14, %v875_v16 }
 0x27c   : > { %v877_v18 = vmul.f32 1.442695, %v876_v17 }
 0x27e   : > { %1258 = vpow2.f32 %v877_v18 }
 0x28b   : > { %v1259_v19 = vpop.eup %1258 }
 0x28c   : > { %v879_v20 = vsel %vm872_vm4, %v1259_v19, 0.0 }
 0x28d   : > { %880 = vadd.xlane.f32.xlu0 %v879_v20 }
 0x316   : > { %v881_v21 = vpop.xlane.xlu0 %880 }
 0x317   : > { %1260 = vlog2.f32 %v881_v21 }
 0x324   : > { %v1261_v26 = vpop.eup %1260 }
 0x325   : > { %v883_v28 = vmul.f32 0.6931472, %v1261_v26 }
 0x327   : > { %v884_v29 = vsub.f32 %v876_v17, %v883_v28 }
 0x329   : > { %v892_v30 = vrot.slane %v884_v29, %v891_v27 }
 0x32b   : > { %v893_v22 = vcombine.high %v892_v30, %v892_v30  ;;  %v900_v31 = vrot.slane %v892_v30, %v891_v27 }
 0x32d   : > { %v907_v32 = vrot.slane %v893_v22, %v891_v27  ;;  %911 = vst.msk [vmem:[%s1519_s8] sm:$0x1] %vm910_vm5, %v900_v31 }
 0x32f   : > { %912 = vst.msk [vmem:[%s1519_s8 + $0x1] sm:$0x1] %vm910_vm5, %v907_v32 }
 0x330 PF: > { %s1053_s25 = sshll.u32 %s1358_s21, 5  ;;  %s927_s18 = sshll.u32 %s1519_s8, 4  ;;  %s1851_s18 = int_to_ptr.vmem [resolvable:$true] %s927_s18 }
 0x331   : > { %s1848_s30 = scalar_lea.hbm %s1916_s4, %s1053_s25  ;;  %s1855_s9 = scalar_lea.sflag [#allocation6], %s304_s5 }
 0x332   : > { %s1262_s6 = scalar_lea.vmem %s1851_s18, 32  ;;  %s1376_s21 = smov [#allocation5]  }
 0x333   : > { %p1263_p5 = scmp.ne.s32.totalorder %s1851_s18, %s1262_s6  ;;  %s1266_s29 = sshll.u32 %s1376_s21, 4  ;;  %s1267_s29 = int_to_ptr.vmem [resolvable:$false] %s1266_s29 }
 0x334   : > { %s1268_s28 = scalar_lea.vmem %s1267_s29, 64  ;;  %p1269_p9 = scmp.lt.s32.totalorder %s1851_s18, %s1267_s29 }
 0x335   : > { %p1264_p6 = pnand %p1263_p5, %p1476_p7  ;;  %p1270_p10 = scmp.lt.s32.totalorder %s1268_s28, %s1262_s6 }
 0x337   : > { %p1265_p8 = pneg %p1264_p6  ;;  %p1271_p11 = por %p1270_p10, %p1269_p9 }
 0x339   : > { %p1272_p13 = pnand %p1271_p11, %p1265_p8 }
 0x33b   : > { %1275 = shalt.err (!%p1272_p13)
}
 0x33c   : > { %s1276_s5 = scalar_lea.hbm %s1848_s30, 32  ;;  %s1280_s14 = scalar_lea.hbm %s1916_s4, 64 }
 0x33d   : > { %p1277_p0 = scmp.ne.s32.totalorder %s1848_s30, %s1276_s5  ;;  %p1281_p3 = scmp.lt.s32.totalorder %s1848_s30, %s1916_s4 }
 0x33e   : > { %p1282_p4 = scmp.lt.s32.totalorder %s1280_s14, %s1276_s5 }
 0x33f   : > { %p1278_p1 = pnand %p1277_p0, %p1476_p7 }
 0x340   : > { %p1283_p5 = por %p1282_p4, %p1281_p3 }
 0x341   : > { %p1279_p2 = pneg %p1278_p1 }
 0x343   : > { %p1284_p6 = pnand %p1283_p5, %p1279_p2 }
 0x345   : > { %1287 = shalt.err (!%p1284_p6)
}
 0x346   : > { %s1377_s20 = smov 16   ;;  %s1378_s6 = smov 1  }
 0x347   : > { %1163 = dma.vmem_to_hbm [thread:$0]  (%p1476_p7), %s1851_s18, 32, %s1848_s30, %s1855_s9, %s1377_s20, %s1377_s20, %s1378_s6  }
 0x348 PF: > { %p1169_p8 = scmp.ge.s32.totalorder %s1370_s24, 2  ;;  %s942_s21 = sand.u32 1, %s1334_s15  }
 0x349   : > { %s943_s29 = scalar_lea.sflag [#allocation6], %s942_s21 }
 0x34a   : > { %p1166_p9 = pnand %p1169_p8, %p1484_p12 }
 0x34c   : > { %p1167_p10 = pneg %p1166_p9 }
 0x34e   : > { %1329 = dma.done.wait (%p1167_p10), %s943_s29, 32  }
 0x34f   : > { %1331 = vsyncadd (%p1167_p10), %s943_s29, 4294967264  ;;  %s17_s24 = sadd.s32 1, %s1370_s24   ;;  %s1922_s7 = sld [smem:[#allocation8_spill]] }
 0x350   : > { %p14_p11 = scmp.ge.s32.totalorder %s17_s24, 10   ;;  %s1923_s15 = smov %s1338_s16 }
 0x351   : > { %s1924_s16 = smov %s1342_s17  ;;  %s1925_s17 = smov %s1489_s11 }
 0x352   : > { %s1926_s18 = smov %s1350_s19  ;;  %s1927_s19 = smov %s1492_s12 }
 0x353   : > { %s1928_s20 = smov %s1362_s22  ;;  %s1929_s21 = smov %s1366_s23 }
 0x354   : > { %s1930_s22 = smov %s1933_s27  ;;  %16 = sbr.rel (!%p14_p11) target bundleno = 6 (0x6), region = 153 }
 0x355   : > { %s1931_s23 = smov %s1922_s7 }
 0x359   :  { %948 = vsyncpa [#allocation6], 1 }
 0x35a   :  { %950 = vsyncpa [#allocation6 + $0x1], 1 }

</bundles_post_ra>
